<compile_context>
chip_gen: v6e
topology: v6e:2x2x1
jax: 0.10.0
libtpu: 0.0.40
codegen_flags: <defaults>
</compile_context>

<pallas_src>
import jax
import jax.numpy as jnp
from jax.experimental import pallas as pl
from jax.experimental.pallas import tpu as pltpu


def _linear_kernel(x_ref, w_ref, b_ref, o_ref):
    # x_ref: (tm_p, Kp)  w_ref: (Kp, Ep)  b_ref: (1, Ep)  o_ref: (tm_p, Ep)
    acc = jnp.dot(x_ref[...], w_ref[...], preferred_element_type=jnp.float32)
    o_ref[...] = (acc + b_ref[...]).astype(o_ref.dtype)


def _chip_budget():
    """(points-per-grid-step target, VMEM byte budget) by TPU generation."""
    try:
        kind = jax.devices()[0].device_kind.lower()
    except Exception:
        kind = ""
    if "v7" in kind:
        return 64 * 1024, 24 << 20   # 32 MiB default scoped VMEM, 64 MiB physical
    if "v6" in kind:
        return 32 * 1024, 24 << 20   # 32 MiB default scoped VMEM
    return 16 * 1024, 12 << 20       # v5e / unknown: 16 MiB default scoped VMEM


def _pick_packing(M, K, E):
    """Largest P = (128 // E) * 2**j with P*K <= 128, preferring P | M.

    P | M means zero row padding and no trailing output slice.
    """
    if not (E < 128 and 128 % E == 0):
        return 1
    base = 128 // E
    cands = [base]
    p = base * 2
    while p * K <= 128:
        cands.append(p)
        p *= 2
    for c in reversed(cands):
        if M % c == 0:
            return c
    return cands[-1]


def decode_xyz_pos_embed(points, weight, bias, *, tm_packed=None,
                         small_m_fallback=4096):
    """points: (B, N, point_dim) -> (B, N, embed_dim); points @ weight + bias.

    `weight` is stored (point_dim, embed_dim) (transpose of the torch
    nn.Linear weight); `bias` is (embed_dim,).
    """
    B, N, K = points.shape
    E = weight.shape[1]
    M = B * N

    # Decode-style tiny calls: a fused XLA matmul beats kernel launch +
    # packing prologue.  Pass small_m_fallback=0 to force the Pallas path.
    if M < small_m_fallback:
        out = points.reshape(M, K) @ weight + bias
        return out.reshape(B, N, E)

    P = _pick_packing(M, K, E)
    Kp, Ep = P * K, P * E

    # Pad rows only to a multiple of P (usually zero — see _pick_packing).
    m_pad = pl.cdiv(M, P) * P
    x = points.reshape(M, K)
    if m_pad != M:
        x = jnp.pad(x, ((0, m_pad - M), (0, 0)))   # rare path
    m_packed = m_pad // P
    x_packed = x.reshape(m_packed, Kp)

    if P > 1:
        # Block-diagonal weight / tiled bias: kernel writes full 128-lane rows.
        # Depends only on (weight, bias, P); tiny (~Kp*Ep f32) and folded by
        # XLA when params are jit constants.
        w_packed = jnp.kron(jnp.eye(P, dtype=weight.dtype), weight)   # (Kp, Ep)
        b_packed = jnp.tile(bias, P).reshape(1, Ep)
    else:
        w_packed = weight
        b_packed = bias.reshape(1, Ep)

    # Row-tile size: per-chip points/step target (amortize ~0.35us/step) capped
    # by a conservative double-buffered VMEM budget (lane-padded f32 tiles).
    if tm_packed is None:
        target_points, vmem_budget = _chip_budget()
        kp_lanes = -(-Kp // 128) * 128
        ep_lanes = -(-Ep // 128) * 128
        bytes_per_row = 2 * 4 * (kp_lanes + ep_lanes)   # in + out, x2 buffers
        tm_budget = max(8, min(target_points // P, vmem_budget // bytes_per_row))
    else:
        tm_budget = max(8, tm_packed)

    if m_packed <= tm_budget:
        tm_p = m_packed            # single full block (block dim == full dim)
    else:
        tm_p = (tm_budget // 8) * 8   # sublane-aligned; Pallas handles the
                                      # partial last block (OOB rows unwritten)
    grid = (pl.cdiv(m_packed, tm_p),)

    out_packed = pl.pallas_call(
        _linear_kernel,
        out_shape=jax.ShapeDtypeStruct((m_packed, Ep), points.dtype),
        grid_spec=pltpu.PrefetchScalarGridSpec(
            num_scalar_prefetch=0,
            grid=grid,
            in_specs=[
                # Streamed row tiles.  (On v7x, pipeline_mode=pl.Buffered(3)
                # here and on out_specs is a possible small further win.)
                pl.BlockSpec((tm_p, Kp), lambda i: (i, 0)),
                pl.BlockSpec((Kp, Ep), lambda i: (0, 0)),     # resident weight
                pl.BlockSpec((1, Ep), lambda i: (0, 0)),      # resident bias
            ],
            out_specs=pl.BlockSpec((tm_p, Ep), lambda i: (i, 0)),
        ),
        compiler_params=pltpu.CompilerParams(
            dimension_semantics=("parallel",),   # shards rows across v7x TCs
        ),
    )(x_packed, w_packed, b_packed)

    # (m_packed, P*E) -> (m_pad, E) is a free contiguous view.
    out = out_packed.reshape(m_pad, E)
    if m_pad != M:
        out = out[:M]              # rare path: only when M % P != 0
    return out.reshape(B, N, E)


def reference(points, weight, bias):
    return jnp.einsum("bnk,ke->bne", points, weight) + bias


if __name__ == "__main__":
    B, N, point_dim, embed_dim = 2, 8, 3, 32

    key = jax.random.PRNGKey(0)
    k_pts, k_w, k_b = jax.random.split(key, 3)

    points = jax.random.normal(k_pts, (B, N, point_dim), dtype=jnp.float32)
    bound = 1.0 / point_dim ** 0.5
    # Deterministic "nn.Linear"-style params (synthetic init, not a checkpoint).
    weight = jax.random.uniform(k_w, (point_dim, embed_dim), jnp.float32,
                                minval=-bound, maxval=bound)
    bias = jax.random.uniform(k_b, (embed_dim,), jnp.float32,
                              minval=-bound, maxval=bound)

    ref = reference(points, weight, bias)

    # Small shape forced through the Pallas kernel (single-block path).
    out = jax.block_until_ready(
        decode_xyz_pos_embed(points, weight, bias, small_m_fallback=0))
    assert out.shape == (B, N, embed_dim)
    assert jnp.allclose(out, ref, atol=1e-5, rtol=1e-5)

    # Same small shape through the default fast path (einsum fallback).
    out_fb = jax.block_until_ready(decode_xyz_pos_embed(points, weight, bias))
    assert jnp.allclose(out_fb, ref, atol=1e-5, rtol=1e-5)

    # Larger case: multi-step grid with a partial final block and zero row
    # padding (M = 20000 is a multiple of P = 32), validating tiling.
    B2, N2 = 4, 5000
    pts2 = jax.random.normal(jax.random.PRNGKey(1), (B2, N2, point_dim),
                             jnp.float32)
    out2 = jax.block_until_ready(decode_xyz_pos_embed(pts2, weight, bias))
    ref2 = reference(pts2, weight, bias)
    assert jnp.allclose(out2, ref2, atol=1e-5, rtol=1e-5)

    print("KERNEL_OK")
</pallas_src>

<mosaic_0001>
module attributes {stable_mosaic.version = 11 : i64} {
  func.func @_linear_kernel(%arg0: i32, %arg1: memref<1x48xf32, #tpu.memory_space<vmem>>, %arg2: memref<48x512xf32, #tpu.memory_space<vmem>>, %arg3: memref<1x512xf32, #tpu.memory_space<vmem>>, %arg4: memref<1x512xf32, #tpu.memory_space<vmem>>) attributes {dimension_semantics = [#tpu.dimension_semantics<parallel>], iteration_bounds = array<i64: 1>, scalar_prefetch = 0 : i64, scratch_operands = 0 : i64, tpu.core_type = #tpu.core_type<tc>, window_params = [{transform_indices = @transform_0, window_bounds = array<i64: 1, 48>}, {pipeline_mode = #tpu.pipeline_mode<synchronous>, transform_indices = @transform_1, window_bounds = array<i64: 48, 512>}, {pipeline_mode = #tpu.pipeline_mode<synchronous>, transform_indices = @transform_2, window_bounds = array<i64: 1, 512>}, {transform_indices = @transform_3, window_bounds = array<i64: 1, 512>}]} {
    %c0 = arith.constant 0 : index
    %c0_0 = arith.constant 0 : index
    %0 = vector.load %arg1[%c0, %c0_0] : memref<1x48xf32, #tpu.memory_space<vmem>>, vector<1x48xf32>
    %c0_1 = arith.constant 0 : index
    %c0_2 = arith.constant 0 : index
    %1 = vector.load %arg2[%c0_1, %c0_2] : memref<48x512xf32, #tpu.memory_space<vmem>>, vector<48x512xf32>
    %cst = arith.constant dense<0.000000e+00> : vector<1x512xf32>
    %2 = tpu.matmul %0, %1, %cst {dimension_numbers = #tpu.dot_dimension_numbers<[1], [0], [0], [1], [0, 0, 1, 1], [], []>} : vector<1x48xf32>, vector<48x512xf32>, vector<1x512xf32> -> vector<1x512xf32>
    %c0_3 = arith.constant 0 : index
    %c0_4 = arith.constant 0 : index
    %3 = vector.load %arg3[%c0_3, %c0_4] : memref<1x512xf32, #tpu.memory_space<vmem>>, vector<1x512xf32>
    %4 = arith.addf %2, %3 : vector<1x512xf32>
    %c0_5 = arith.constant 0 : index
    %c0_6 = arith.constant 0 : index
    %5 = vector.load %arg4[%c0_5, %c0_6] : memref<1x512xf32, #tpu.memory_space<vmem>>, vector<1x512xf32>
    tpu.vector_store %arg4[%c0_5, %c0_6], %4 {strides = array<i32>} : memref<1x512xf32, #tpu.memory_space<vmem>>, vector<1x512xf32>,
    return
  }
  func.func @transform_0(%arg0: i32) -> (i32, i32) {
    %c0_i32 = arith.constant 0 : i32
    %c0_i32_0 = arith.constant 0 : i32
    return %arg0, %c0_i32 : i32, i32
  }
  func.func @transform_1(%arg0: i32) -> (i32, i32) {
    %c0_i32 = arith.constant 0 : i32
    %c0_i32_0 = arith.constant 0 : i32
    %c0_i32_1 = arith.constant 0 : i32
    return %c0_i32, %c0_i32_0 : i32, i32
  }
  func.func @transform_2(%arg0: i32) -> (i32, i32) {
    %c0_i32 = arith.constant 0 : i32
    %c0_i32_0 = arith.constant 0 : i32
    %c0_i32_1 = arith.constant 0 : i32
    return %c0_i32, %c0_i32_0 : i32, i32
  }
  func.func @transform_3(%arg0: i32) -> (i32, i32) {
    %c0_i32 = arith.constant 0 : i32
    %c0_i32_0 = arith.constant 0 : i32
    return %arg0, %c0_i32 : i32, i32
  }
}

</mosaic_0001>

<bundles_post_ra>
// kernel: tpu_custom_call.1
= control target key start
LH: loop header
LB: loop body
LE: loop exit
PB: predicated region body
PF: predicated region fallthrough
CT: control target
= control target key end

     0   :  { %8 = vsyncpa [#allocation3], 0  ;;  %s431_s0 = inlined_call_operand.hbm [shape: f32[1,48], index: 0, kind: input, shape index: {}]   ;;  %s432_s1 = inlined_call_operand.hbm [shape: f32[48,512], index: 1, kind: input, shape index: {}]   ;;  %s433_s2 = inlined_call_operand.hbm [shape: f32[1,512], index: 2, kind: input, shape index: {}]   ;;  %s434_s3 = inlined_call_operand.hbm [shape: f32[1,512], index: 3, kind: output, shape index: {}]  }
   0x1   :  { %9 = vsyncpa [#allocation6], 0 }
   0x2   :  { %10 = vsyncpa [#allocation4], 0  ;;  %s391_s12 = smov [#allocation5]  }
   0x3   :  { %s26_s13 = sshll.u32 %s391_s12, 4  ;;  %s27_s13 = int_to_ptr.vmem [resolvable:$true] %s26_s13 }
   0x4   :  { %s313_s14 = scalar_lea.vmem %s27_s13, 3072  ;;  %p318_p1 = scmp.lt.s32.totalorder %s27_s13, %s27_s13 }
   0x5   :  { %p314_p0 = scmp.ne.s32.totalorder %s27_s13, %s313_s14  ;;  %p319_p2 = scmp.lt.s32.totalorder %s313_s14, %s313_s14 }
   0x7   :  { %p320_p3 = por %p319_p2, %p318_p1 }
   0x9   :  { %p321_p4 = pnand %p320_p3, %p314_p0 }
   0xb   :  { %324 = shalt.err (!%p321_p4)
}
   0xc   :  { %s392_s15 = smov 512   ;;  %s393_s16 = smov 32  }
   0xd   :  { %32 = dma.hbm_to_vmem [thread:$0]  %s432_s1, 3072, %s27_s13, [#allocation6], %s392_s15, %s392_s15, %s393_s16  }
   0xe   :  { %s394_s19 = smov [#allocation2]   ;;  %s395_s21 = smov [#allocation7]  }
   0xf   :  { %s17_s20 = sshll.u32 %s394_s19, 4  ;;  %s39_s22 = sshll.u32 %s395_s21, 4  ;;  %s18_s20 = int_to_ptr.vmem [resolvable:$true] %s17_s20  ;;  %s40_s22 = int_to_ptr.vmem [resolvable:$true] %s39_s22 }
  0x10   :  { %s333_s23 = scalar_lea.vmem %s18_s20, 16  ;;  %s337_s24 = scalar_lea.vmem %s18_s20, 32 }
  0x11   :  { %p334_p5 = scmp.ne.s32.totalorder %s18_s20, %s333_s23  ;;  %p338_p6 = scmp.lt.s32.totalorder %s18_s20, %s18_s20 }
  0x12   :  { %p339_p7 = scmp.lt.s32.totalorder %s337_s24, %s333_s23 }
  0x14   :  { %p340_p8 = por %p339_p7, %p338_p6 }
  0x16   :  { %p341_p9 = pnand %p340_p8, %p334_p5 }
  0x18   :  { %344 = shalt.err (!%p341_p9)
}
  0x19   :  { %20 = dma.hbm_to_vmem [thread:$0]  %s431_s0, 16, %s18_s20, [#allocation3]  }
  0x1a   :  { %s353_s27 = scalar_lea.vmem %s40_s22, 64  ;;  %p358_p11 = scmp.lt.s32.totalorder %s40_s22, %s40_s22 }
  0x1b   :  { %p354_p10 = scmp.ne.s32.totalorder %s40_s22, %s353_s27  ;;  %p359_p12 = scmp.lt.s32.totalorder %s353_s27, %s353_s27 }
  0x1d   :  { %p360_p13 = por %p359_p12, %p358_p11 }
  0x1f   :  { %p361_p0 = pnand %p360_p13, %p354_p10 }
  0x21   :  { %364 = shalt.err (!%p361_p0)
}
  0x22   :  { %42 = dma.hbm_to_vmem [thread:$0]  %s433_s2, 64, %s40_s22, [#allocation6]  }
  0x23   :  { %385 = dma.done.wait [#allocation3], 16  }
  0x24   :  { %386 = vsyncadd [#allocation3], 4294967280 }
  0x25   :  { %387 = dma.done.wait [#allocation6], 3136  }
  0x26   :  { %388 = vsyncadd [#allocation6], 4294964160  ;;  %v396_v0 = vmov 0.0   ;;  %v74_v1 = vld [vmem:[#allocation5 + $0xa8] sm:$0xff]  ;;  %v76_v2 = vld [vmem:[#allocation5 + $0xb8] sm:$0xff]  ;;  %vm99_vm0 = vcmask 392192   ;;  %v79_v26 = vlaneseq }
  0x27   :  { %167 = vmatprep.mubr.f32.mxu0 %v396_v0  ;;  %238 = vmatprep.mubr.f32.mxu1 %v396_v0  ;;  %v73_v3 = vld [vmem:[#allocation5 + $0xa0] sm:$0xff]  ;;  %v75_v4 = vld [vmem:[#allocation5 + $0xb0] sm:$0xff]  ;;  %v70_v5 = vld [vmem:[#allocation5 + $0x88] sm:$0xff]  ;;  %v397_v28 = vmov 1966171168   ;;  %s398_s0 = smov [#allocation8]  }
  0x28   :  { %123 = vmatprep.subr.mxu0 %v74_v1  ;;  %194 = vmatprep.subr.mxu1 %v76_v2  ;;  %v72_v6 = vld [vmem:[#allocation5 + $0x98] sm:$0xff]  ;;  %v69_v7 = vld [vmem:[#allocation5 + $0x80] sm:$0xff]  ;;  %v71_v8 = vld [vmem:[#allocation5 + $0x90] sm:$0xff]  ;;  %v80_v27 = vshrl.u32 %v79_v26, 7  ;;  %v252_v29 = vunpack.c.l.s4 %v397_v28  ;;  %s285_s2 = sshll.u32 %s398_s0, 4  ;;  %vm276_vm1 = vcmp.lt.s32.totalorder %v79_v26, 512  ;;  %s286_s2 = int_to_ptr.vmem [resolvable:$true] %s285_s2 }
  0x29   :  { %124 = vmatpush1.msra.mxu0 %v73_v3  ;;  %195 = vmatpush1.msra.mxu1 %v75_v4  ;;  %v66_v9 = vld [vmem:[#allocation5 + $0x68] sm:$0xff]  ;;  %v68_v10 = vld [vmem:[#allocation5 + $0x78] sm:$0xff]  ;;  %v65_v11 = vld [vmem:[#allocation5 + $0x60] sm:$0xff]  ;;  %s365_s29 = scalar_lea.vmem %s286_s2, 64  ;;  %p370_p2 = scmp.lt.s32.totalorder %s286_s2, %s286_s2 }
  0x2a   :  { %125 = vmatprep.subr.mxu0 %v70_v5  ;;  %196 = vmatprep.subr.mxu1 %v72_v6  ;;  %v67_v12 = vld [vmem:[#allocation5 + $0x70] sm:$0xff]  ;;  %v62_v13 = vld [vmem:[#allocation5 + $0x48] sm:$0xff]  ;;  %v64_v14 = vld [vmem:[#allocation5 + $0x58] sm:$0xff]  ;;  %v81_v30 = vsub.s32 0, %v80_v27  ;;  %v89_v31 = vsub.s32 2, %v80_v27  ;;  %v85_v32 = vsub.s32 1, %v80_v27  ;;  %v253_v35 = vunpack.c.0.s8 %v252_v29  ;;  %p366_p1 = scmp.ne.s32.totalorder %s286_s2, %s365_s29  ;;  %p371_p3 = scmp.lt.s32.totalorder %s365_s29, %s365_s29 }
  0x2b   :  { %126 = vmatpush1.msra.mxu0 %v69_v7  ;;  %197 = vmatpush1.msra.mxu1 %v71_v8  ;;  %v61_v15 = vld [vmem:[#allocation5 + $0x40] sm:$0xff]  ;;  %v63_v16 = vld [vmem:[#allocation5 + $0x50] sm:$0xff]  ;;  %v58_v17 = vld [vmem:[#allocation5 + $0x28] sm:$0xff]  ;;  %v93_v33 = vsub.s32 3, %v80_v27 }
  0x2c   :  { %127 = vmatprep.subr.mxu0 %v66_v9  ;;  %198 = vmatprep.subr.mxu1 %v68_v10  ;;  %v60_v18 = vld [vmem:[#allocation5 + $0x38] sm:$0xff]  ;;  %v57_v19 = vld [vmem:[#allocation5 + $0x20] sm:$0xff]  ;;  %v59_v20 = vld [vmem:[#allocation5 + $0x30] sm:$0xff]  ;;  %v256_v43 = vsub.s32 %v253_v35, %v80_v27  ;;  %p372_p4 = por %p371_p3, %p370_p2 }
  0x2d   :  { %128 = vmatpush1.msra.mxu0 %v65_v11  ;;  %199 = vmatpush1.msra.mxu1 %v67_v12  ;;  %v54_v21 = vld [vmem:[#allocation5 + $0x8] sm:$0xff]  ;;  %v56_v22 = vld [vmem:[#allocation5 + $0x18] sm:$0xff]  ;;  %v53_v23 = vld [vmem:[#allocation5] sm:$0xff] }
  0x2e   :  { %129 = vmatprep.subr.mxu0 %v62_v13  ;;  %200 = vmatprep.subr.mxu1 %v64_v14  ;;  %v55_v24 = vld [vmem:[#allocation5 + $0x10] sm:$0xff]  ;;  %v52_v25 = vld [vmem:[#allocation2] sm:$0x1]  ;;  %v77_v34 = vld [vmem:[#allocation7] sm:$0xf]  ;;  %p373_p5 = pnand %p372_p4, %p366_p1 }
  0x2f   :  { %130 = vmatpush1.msra.mxu0 %v61_v15  ;;  %201 = vmatpush1.msra.mxu1 %v63_v16  ;;  %v82_v36 = vrot.slane %v77_v34, %v81_v30  ;;  %v90_v37 = vrot.slane %v77_v34, %v89_v31  ;;  %v86_v38 = vrot.slane %v77_v34, %v85_v32 }
  0x30   :  { %131 = vmatprep.subr.mxu0 %v58_v17  ;;  %202 = vmatprep.subr.mxu1 %v60_v18  ;;  %v94_v39 = vrot.slane %v77_v34, %v93_v33 }
  0x31   :  { %132 = vmatpush1.msra.mxu0 %v57_v19  ;;  %203 = vmatpush1.msra.mxu1 %v59_v20 }
  0x32   :  { %133 = vmatprep.subr.mxu0 %v54_v21  ;;  %204 = vmatprep.subr.mxu1 %v56_v22 }
  0x33   :  { %134 = vmatpush1.msra.mxu0 %v53_v23  ;;  %205 = vmatpush1.msra.mxu1 %v55_v24 }
  0x34   :  { %295 = vmatmul.mubr.msk.f32.vlgmr.msra.gmra.mxu0 %vm99_vm0, %v52_v25  ;;  %296 = vmatmul.mubr.msk.f32.vlgmr.msra.gmra.mxu1 %vm99_vm0, %v52_v25 }
  0xf4   :  { %v169_v40 = vpop.f32.mrf.mxu0  ;;  %v240_v41 = vpop.f32.mrf.mxu1 }
  0xf5   :  { %v170_v45 = vadd.f32 %v169_v40, %v82_v36  ;;  %v241_v46 = vadd.f32 %v240_v41, %v90_v37 }
  0xf6   :  { %v171_v42 = vpop.f32.mrf.mxu0  ;;  %v242_v44 = vpop.f32.mrf.mxu1 }
  0xf7   :  { %v172_v47 = vadd.f32 %v171_v42, %v86_v38  ;;  %v243_v48 = vadd.f32 %v242_v44, %v94_v39 }
  0xf9   :  { %v249_v49 = vcombine.low %v170_v45, %v172_v47  ;;  %v250_v50 = vcombine.low %v241_v46, %v243_v48 }
  0xfb   :  { %v257_v51 = vrot.slane %v249_v49, %v256_v43  ;;  %v264_v52 = vrot.slane %v250_v50, %v256_v43 }
  0xfd   :  { %v265_v53 = vcombine.low %v257_v51, %v264_v52 }
  0xff   :  { %v272_v54 = vrot.slane %v265_v53, %v256_v43 }
 0x101   :  { %278 = vst.msk [vmem:[#allocation8] sm:$0xf] %vm276_vm1, %v272_v54 }
 0x102   :  { %376 = shalt.err (!%p373_p5)
}
 0x103   :  { %288 = dma.vmem_to_hbm [thread:$0]  %s286_s2, 64, %s434_s3, [#allocation4]  }
 0x104   :  { %389 = dma.done.wait [#allocation4], 64  }
 0x105   :  { %390 = vsyncadd [#allocation4], 4294967232 }
 0x106   :  { %292 = vsyncpa [#allocation3], 1 }
 0x107   :  { %293 = vsyncpa [#allocation6], 1 }
 0x108   :  { %294 = vsyncpa [#allocation4], 1 }

</bundles_post_ra>
